<compile_context>
chip_gen: v7x
topology: tpu7x:2x2x1
jax: 0.10.0
libtpu: 0.0.40
codegen_flags: <defaults>
</compile_context>

<pallas_src>
import numpy as np
import jax
import jax.numpy as jnp
from jax.experimental import pallas as pl
from jax.experimental.pallas import tpu as pltpu


# ----------------------- constant band matrices ------------------------------
def _band_matrices(h, w):
    """Band matrices encoding [1,2,1]/4 blur + stride-2 with reflect padding folded in.

    Returns A_T (Ho, H) and B (W, Wo) such that  A_T @ x @ B  ==
    conv2d(reflect_pad(x), gaussian_3x3/16)[0::2, 0::2]  for a single plane x.
    """
    ho, wo = (h + 1) // 2, (w + 1) // 2
    a_t = np.zeros((ho, h), np.float32)
    for o in range(ho):
        for d, wt in ((-1, 0.25), (0, 0.5), (1, 0.25)):
            r = 2 * o + d
            if r < 0:
                r = -r                     # reflect: -1 -> 1
            if r > h - 1:
                r = 2 * (h - 1) - r        # reflect: h -> h-2
            a_t[o, r] += wt
    b = np.zeros((w, wo), np.float32)
    for o in range(wo):
        for d, wt in ((-1, 0.25), (0, 0.5), (1, 0.25)):
            c = 2 * o + d
            if c < 0:
                c = -c
            if c > w - 1:
                c = 2 * (w - 1) - c
            b[c, o] += wt
    return a_t, b


def _choose_bp(nc, h, w, itemsize):
    """Planes per grid step: big enough for dense tiles, small enough for VMEM,
    and leaving >= 2 grid steps for v7x megacore when possible."""
    budget = 16 * 1024 * 1024
    per_plane = max(1, int(h * w * itemsize * 3))   # input + pyramid outs + temps
    bp = max(1, min(nc, budget // per_plane))
    if nc >= 2:
        bp = max(1, min(bp, nc // 2))
    while nc % bp:                                   # exact tiling of the plane axis
        bp -= 1
    return bp


# ------------------------------- kernel --------------------------------------
def _make_pyramid_kernel(n_down, bp, level_shapes, compute_dtype):
    """Kernel computing all `n_down` blur+downsample levels for one plane batch."""

    def kernel(*refs):
        x_ref = refs[0]
        band_refs = refs[1:1 + 2 * n_down]
        out_refs = refs[1 + 2 * n_down:]

        cur = x_ref[...]                                     # (Bp, H, W)
        for l in range(n_down):
            h, w = level_shapes[l]
            ho, wo = (h + 1) // 2, (w + 1) // 2
            a_t = band_refs[2 * l][...]                      # (Ho, H)  resident
            b = band_refs[2 * l + 1][...]                    # (W, Wo)  resident

            # Horizontal blur + stride-2: one dense matmul over all Bp planes.
            lhs = cur.reshape(bp * h, w).astype(compute_dtype)
            tmp = jnp.dot(lhs, b, preferred_element_type=jnp.float32)
            tmp = tmp.reshape(bp, h, wo).astype(compute_dtype)

            # Vertical blur + stride-2, per plane (static small loop).
            o_ref = out_refs[l]
            for p in range(bp):
                o_ref[p] = jnp.dot(a_t, tmp[p],
                                   preferred_element_type=jnp.float32
                                   ).astype(o_ref.dtype)

            # Level result stays in VMEM and feeds the next level directly.
            cur = o_ref[...]

    return kernel


# ------------------------------- wrapper --------------------------------------
def image_pyramid(x, start_level, end_level):
    """Mirrors ImagePyramidModule.forward: returns list from smallest to largest."""
    N, C, H, W = x.shape
    n_down = end_level - 1
    if n_down <= 0:
        return [x]

    nc = N * C
    compute_dtype = jnp.bfloat16 if x.dtype == jnp.bfloat16 else jnp.float32
    bp = _choose_bp(nc, H, W, x.dtype.itemsize)
    x2 = x.reshape(nc, H, W)

    # Per-level spatial shapes and reflect-folded band matrices (built once).
    level_shapes = []
    bands = []
    h, w = H, W
    for _ in range(n_down):
        level_shapes.append((h, w))
        a_t, b = _band_matrices(h, w)
        bands.append(jnp.asarray(a_t, dtype=compute_dtype))
        bands.append(jnp.asarray(b, dtype=compute_dtype))
        h, w = (h + 1) // 2, (w + 1) // 2

    out_shapes = tuple(
        jax.ShapeDtypeStruct((nc, (hh + 1) // 2, (ww + 1) // 2), x.dtype)
        for (hh, ww) in level_shapes)

    in_specs = [pl.BlockSpec((bp, H, W), lambda i: (i, 0, 0))]
    for arr in bands:
        in_specs.append(pl.BlockSpec(arr.shape, lambda i: (0, 0)))  # resident
    out_specs = [pl.BlockSpec((bp, s.shape[1], s.shape[2]), lambda i: (i, 0, 0))
                 for s in out_shapes]

    kernel = _make_pyramid_kernel(n_down, bp, level_shapes, compute_dtype)

    outs = pl.pallas_call(
        kernel,
        out_shape=out_shapes,
        grid_spec=pltpu.PrefetchScalarGridSpec(
            num_scalar_prefetch=0,
            grid=(nc // bp,),
            in_specs=in_specs,
            out_specs=out_specs,
        ),
        compiler_params=pltpu.CompilerParams(
            dimension_semantics=("parallel",),
            vmem_limit_bytes=64 * 1024 * 1024),
    )(x2, *bands)
    if not isinstance(outs, (tuple, list)):
        outs = (outs,)

    # levels[i] = x downsampled i times, in NCHW.
    levels = [x] + [o.reshape(N, C, o.shape[1], o.shape[2]) for o in outs]

    pyr = []
    for i in range(end_level - 1):
        if i >= start_level:
            pyr.insert(0, levels[i])
    pyr.insert(0, levels[end_level - 1])
    return pyr


# ------------------------- pure-JAX reference ---------------------------------
def _ref_blur_downsample(x):
    k = jnp.array([[1.0, 2.0, 1.0],
                   [2.0, 4.0, 2.0],
                   [1.0, 2.0, 1.0]], dtype=jnp.float32) / 16.0
    xp = jnp.pad(x, ((0, 0), (0, 0), (1, 1), (1, 1)), mode="reflect")
    H, W = x.shape[2], x.shape[3]
    out = sum(k[di, dj] * xp[:, :, di:di + H, dj:dj + W]
              for di in range(3) for dj in range(3))
    return out[:, :, 0::2, 0::2].astype(x.dtype)


def _ref_image_pyramid(x, start_level, end_level):
    pyr = []
    x_level = x
    for i in range(end_level - 1):
        if i >= start_level:
            pyr.insert(0, x_level)
        x_level = _ref_blur_downsample(x_level)
    pyr.insert(0, x_level)
    return pyr


if __name__ == "__main__":
    key = jax.random.PRNGKey(0)
    N, C, H, W = 2, 4, 16, 16
    start_level, end_level = 0, 3
    x = jax.random.normal(key, (N, C, H, W), dtype=jnp.float32)

    pyr = image_pyramid(x, start_level, end_level)
    pyr = [jax.block_until_ready(p) for p in pyr]

    ref = _ref_image_pyramid(x, start_level, end_level)
    assert len(pyr) == len(ref)
    for got, want in zip(pyr, ref):
        assert got.shape == want.shape and got.dtype == want.dtype
        assert jnp.allclose(got, want, atol=1e-5, rtol=1e-5), "mismatch vs reference"

    print("KERNEL_OK")
</pallas_src>

<mosaic_0001>
module attributes {stable_mosaic.version = 11 : i64} {
  func.func @kernel(%arg0: i32, %arg1: memref<4x16x16xf32, #tpu.memory_space<vmem>>, %arg2: memref<8x16xf32, #tpu.memory_space<vmem>>, %arg3: memref<16x8xf32, #tpu.memory_space<vmem>>, %arg4: memref<4x8xf32, #tpu.memory_space<vmem>>, %arg5: memref<8x4xf32, #tpu.memory_space<vmem>>, %arg6: memref<4x8x8xf32, #tpu.memory_space<vmem>>, %arg7: memref<4x4x4xf32, #tpu.memory_space<vmem>>) attributes {dimension_semantics = [#tpu.dimension_semantics<parallel>], iteration_bounds = array<i64: 2>, scalar_prefetch = 0 : i64, scratch_operands = 0 : i64, tpu.core_type = #tpu.core_type<tc>, window_params = [{transform_indices = @transform_0, window_bounds = array<i64: 4, 16, 16>}, {pipeline_mode = #tpu.pipeline_mode<synchronous>, transform_indices = @transform_1, window_bounds = array<i64: 8, 16>}, {pipeline_mode = #tpu.pipeline_mode<synchronous>, transform_indices = @transform_2, window_bounds = array<i64: 16, 8>}, {pipeline_mode = #tpu.pipeline_mode<synchronous>, transform_indices = @transform_3, window_bounds = array<i64: 4, 8>}, {pipeline_mode = #tpu.pipeline_mode<synchronous>, transform_indices = @transform_4, window_bounds = array<i64: 8, 4>}, {transform_indices = @transform_5, window_bounds = array<i64: 4, 8, 8>}, {transform_indices = @transform_6, window_bounds = array<i64: 4, 4, 4>}]} {
    %c0 = arith.constant 0 : index
    %c0_0 = arith.constant 0 : index
    %c0_1 = arith.constant 0 : index
    %0 = vector.load %arg1[%c0, %c0_0, %c0_1] : memref<4x16x16xf32, #tpu.memory_space<vmem>>, vector<4x16x16xf32>
    %c0_2 = arith.constant 0 : index
    %c0_3 = arith.constant 0 : index
    %1 = vector.load %arg2[%c0_2, %c0_3] : memref<8x16xf32, #tpu.memory_space<vmem>>, vector<8x16xf32>
    %c0_4 = arith.constant 0 : index
    %c0_5 = arith.constant 0 : index
    %2 = vector.load %arg3[%c0_4, %c0_5] : memref<16x8xf32, #tpu.memory_space<vmem>>, vector<16x8xf32>
    %3 = vector.shape_cast %0 : vector<4x16x16xf32> to vector<64x16xf32>
    %cst = arith.constant dense<0.000000e+00> : vector<64x8xf32>
    %4 = tpu.matmul %3, %2, %cst {dimension_numbers = #tpu.dot_dimension_numbers<[1], [0], [0], [1], [0, 0, 1, 1], [], []>} : vector<64x16xf32>, vector<16x8xf32>, vector<64x8xf32> -> vector<64x8xf32>
    %5 = vector.shape_cast %4 : vector<64x8xf32> to vector<4x16x8xf32>
    %6 = vector.extract_strided_slice %5 {offsets = [0, 0, 0], sizes = [1, 16, 8], strides = [1, 1, 1]} : vector<4x16x8xf32> to vector<1x16x8xf32>
    %7 = vector.shape_cast %6 : vector<1x16x8xf32> to vector<16x8xf32>
    %cst_6 = arith.constant dense<0.000000e+00> : vector<8x8xf32>
    %8 = tpu.matmul %1, %7, %cst_6 {dimension_numbers = #tpu.dot_dimension_numbers<[1], [0], [0], [1], [0, 0, 1, 1], [], []>} : vector<8x16xf32>, vector<16x8xf32>, vector<8x8xf32> -> vector<8x8xf32>
    %c0_7 = arith.constant 0 : index
    %c0_8 = arith.constant 0 : index
    %c0_9 = arith.constant 0 : index
    %9 = vector.load %arg6[%c0_7, %c0_8, %c0_9] : memref<4x8x8xf32, #tpu.memory_space<vmem>>, vector<1x8x8xf32>
    %10 = vector.shape_cast %9 : vector<1x8x8xf32> to vector<8x8xf32>
    %11 = vector.shape_cast %8 : vector<8x8xf32> to vector<1x8x8xf32>
    tpu.vector_store %arg6[%c0_7, %c0_8, %c0_9], %11 {strides = array<i32>} : memref<4x8x8xf32, #tpu.memory_space<vmem>>, vector<1x8x8xf32>,
    %12 = vector.extract_strided_slice %5 {offsets = [1, 0, 0], sizes = [1, 16, 8], strides = [1, 1, 1]} : vector<4x16x8xf32> to vector<1x16x8xf32>
    %13 = vector.shape_cast %12 : vector<1x16x8xf32> to vector<16x8xf32>
    %cst_10 = arith.constant dense<0.000000e+00> : vector<8x8xf32>
    %14 = tpu.matmul %1, %13, %cst_10 {dimension_numbers = #tpu.dot_dimension_numbers<[1], [0], [0], [1], [0, 0, 1, 1], [], []>} : vector<8x16xf32>, vector<16x8xf32>, vector<8x8xf32> -> vector<8x8xf32>
    %c1 = arith.constant 1 : index
    %c0_11 = arith.constant 0 : index
    %c0_12 = arith.constant 0 : index
    %15 = vector.load %arg6[%c1, %c0_11, %c0_12] : memref<4x8x8xf32, #tpu.memory_space<vmem>>, vector<1x8x8xf32>
    %16 = vector.shape_cast %15 : vector<1x8x8xf32> to vector<8x8xf32>
    %17 = vector.shape_cast %14 : vector<8x8xf32> to vector<1x8x8xf32>
    tpu.vector_store %arg6[%c1, %c0_11, %c0_12], %17 {strides = array<i32>} : memref<4x8x8xf32, #tpu.memory_space<vmem>>, vector<1x8x8xf32>,
    %18 = vector.extract_strided_slice %5 {offsets = [2, 0, 0], sizes = [1, 16, 8], strides = [1, 1, 1]} : vector<4x16x8xf32> to vector<1x16x8xf32>
    %19 = vector.shape_cast %18 : vector<1x16x8xf32> to vector<16x8xf32>
    %cst_13 = arith.constant dense<0.000000e+00> : vector<8x8xf32>
    %20 = tpu.matmul %1, %19, %cst_13 {dimension_numbers = #tpu.dot_dimension_numbers<[1], [0], [0], [1], [0, 0, 1, 1], [], []>} : vector<8x16xf32>, vector<16x8xf32>, vector<8x8xf32> -> vector<8x8xf32>
    %c2 = arith.constant 2 : index
    %c0_14 = arith.constant 0 : index
    %c0_15 = arith.constant 0 : index
    %21 = vector.load %arg6[%c2, %c0_14, %c0_15] : memref<4x8x8xf32, #tpu.memory_space<vmem>>, vector<1x8x8xf32>
    %22 = vector.shape_cast %21 : vector<1x8x8xf32> to vector<8x8xf32>
    %23 = vector.shape_cast %20 : vector<8x8xf32> to vector<1x8x8xf32>
    tpu.vector_store %arg6[%c2, %c0_14, %c0_15], %23 {strides = array<i32>} : memref<4x8x8xf32, #tpu.memory_space<vmem>>, vector<1x8x8xf32>,
    %24 = vector.extract_strided_slice %5 {offsets = [3, 0, 0], sizes = [1, 16, 8], strides = [1, 1, 1]} : vector<4x16x8xf32> to vector<1x16x8xf32>
    %25 = vector.shape_cast %24 : vector<1x16x8xf32> to vector<16x8xf32>
    %cst_16 = arith.constant dense<0.000000e+00> : vector<8x8xf32>
    %26 = tpu.matmul %1, %25, %cst_16 {dimension_numbers = #tpu.dot_dimension_numbers<[1], [0], [0], [1], [0, 0, 1, 1], [], []>} : vector<8x16xf32>, vector<16x8xf32>, vector<8x8xf32> -> vector<8x8xf32>
    %c3 = arith.constant 3 : index
    %c0_17 = arith.constant 0 : index
    %c0_18 = arith.constant 0 : index
    %27 = vector.load %arg6[%c3, %c0_17, %c0_18] : memref<4x8x8xf32, #tpu.memory_space<vmem>>, vector<1x8x8xf32>
    %28 = vector.shape_cast %27 : vector<1x8x8xf32> to vector<8x8xf32>
    %29 = vector.shape_cast %26 : vector<8x8xf32> to vector<1x8x8xf32>
    tpu.vector_store %arg6[%c3, %c0_17, %c0_18], %29 {strides = array<i32>} : memref<4x8x8xf32, #tpu.memory_space<vmem>>, vector<1x8x8xf32>,
    %c0_19 = arith.constant 0 : index
    %c0_20 = arith.constant 0 : index
    %c0_21 = arith.constant 0 : index
    %30 = vector.load %arg6[%c0_19, %c0_20, %c0_21] : memref<4x8x8xf32, #tpu.memory_space<vmem>>, vector<4x8x8xf32>
    %c0_22 = arith.constant 0 : index
    %c0_23 = arith.constant 0 : index
    %31 = vector.load %arg4[%c0_22, %c0_23] : memref<4x8xf32, #tpu.memory_space<vmem>>, vector<4x8xf32>
    %c0_24 = arith.constant 0 : index
    %c0_25 = arith.constant 0 : index
    %32 = vector.load %arg5[%c0_24, %c0_25] : memref<8x4xf32, #tpu.memory_space<vmem>>, vector<8x4xf32>
    %33 = vector.shape_cast %30 : vector<4x8x8xf32> to vector<32x8xf32>
    %cst_26 = arith.constant dense<0.000000e+00> : vector<32x4xf32>
    %34 = tpu.matmul %33, %32, %cst_26 {dimension_numbers = #tpu.dot_dimension_numbers<[1], [0], [0], [1], [0, 0, 1, 1], [], []>} : vector<32x8xf32>, vector<8x4xf32>, vector<32x4xf32> -> vector<32x4xf32>
    %35 = vector.shape_cast %34 : vector<32x4xf32> to vector<4x8x4xf32>
    %36 = vector.extract_strided_slice %35 {offsets = [0, 0, 0], sizes = [1, 8, 4], strides = [1, 1, 1]} : vector<4x8x4xf32> to vector<1x8x4xf32>
    %37 = vector.shape_cast %36 : vector<1x8x4xf32> to vector<8x4xf32>
    %cst_27 = arith.constant dense<0.000000e+00> : vector<4x4xf32>
    %38 = tpu.matmul %31, %37, %cst_27 {dimension_numbers = #tpu.dot_dimension_numbers<[1], [0], [0], [1], [0, 0, 1, 1], [], []>} : vector<4x8xf32>, vector<8x4xf32>, vector<4x4xf32> -> vector<4x4xf32>
    %c0_28 = arith.constant 0 : index
    %c0_29 = arith.constant 0 : index
    %c0_30 = arith.constant 0 : index
    %39 = vector.load %arg7[%c0_28, %c0_29, %c0_30] : memref<4x4x4xf32, #tpu.memory_space<vmem>>, vector<1x4x4xf32>
    %40 = vector.shape_cast %39 : vector<1x4x4xf32> to vector<4x4xf32>
    %41 = vector.shape_cast %38 : vector<4x4xf32> to vector<1x4x4xf32>
    tpu.vector_store %arg7[%c0_28, %c0_29, %c0_30], %41 {strides = array<i32>} : memref<4x4x4xf32, #tpu.memory_space<vmem>>, vector<1x4x4xf32>,
    %42 = vector.extract_strided_slice %35 {offsets = [1, 0, 0], sizes = [1, 8, 4], strides = [1, 1, 1]} : vector<4x8x4xf32> to vector<1x8x4xf32>
    %43 = vector.shape_cast %42 : vector<1x8x4xf32> to vector<8x4xf32>
    %cst_31 = arith.constant dense<0.000000e+00> : vector<4x4xf32>
    %44 = tpu.matmul %31, %43, %cst_31 {dimension_numbers = #tpu.dot_dimension_numbers<[1], [0], [0], [1], [0, 0, 1, 1], [], []>} : vector<4x8xf32>, vector<8x4xf32>, vector<4x4xf32> -> vector<4x4xf32>
    %c1_32 = arith.constant 1 : index
    %c0_33 = arith.constant 0 : index
    %c0_34 = arith.constant 0 : index
    %45 = vector.load %arg7[%c1_32, %c0_33, %c0_34] : memref<4x4x4xf32, #tpu.memory_space<vmem>>, vector<1x4x4xf32>
    %46 = vector.shape_cast %45 : vector<1x4x4xf32> to vector<4x4xf32>
    %47 = vector.shape_cast %44 : vector<4x4xf32> to vector<1x4x4xf32>
    tpu.vector_store %arg7[%c1_32, %c0_33, %c0_34], %47 {strides = array<i32>} : memref<4x4x4xf32, #tpu.memory_space<vmem>>, vector<1x4x4xf32>,
    %48 = vector.extract_strided_slice %35 {offsets = [2, 0, 0], sizes = [1, 8, 4], strides = [1, 1, 1]} : vector<4x8x4xf32> to vector<1x8x4xf32>
    %49 = vector.shape_cast %48 : vector<1x8x4xf32> to vector<8x4xf32>
    %cst_35 = arith.constant dense<0.000000e+00> : vector<4x4xf32>
    %50 = tpu.matmul %31, %49, %cst_35 {dimension_numbers = #tpu.dot_dimension_numbers<[1], [0], [0], [1], [0, 0, 1, 1], [], []>} : vector<4x8xf32>, vector<8x4xf32>, vector<4x4xf32> -> vector<4x4xf32>
    %c2_36 = arith.constant 2 : index
    %c0_37 = arith.constant 0 : index
    %c0_38 = arith.constant 0 : index
    %51 = vector.load %arg7[%c2_36, %c0_37, %c0_38] : memref<4x4x4xf32, #tpu.memory_space<vmem>>, vector<1x4x4xf32>
    %52 = vector.shape_cast %51 : vector<1x4x4xf32> to vector<4x4xf32>
    %53 = vector.shape_cast %50 : vector<4x4xf32> to vector<1x4x4xf32>
    tpu.vector_store %arg7[%c2_36, %c0_37, %c0_38], %53 {strides = array<i32>} : memref<4x4x4xf32, #tpu.memory_space<vmem>>, vector<1x4x4xf32>,
    %54 = vector.extract_strided_slice %35 {offsets = [3, 0, 0], sizes = [1, 8, 4], strides = [1, 1, 1]} : vector<4x8x4xf32> to vector<1x8x4xf32>
    %55 = vector.shape_cast %54 : vector<1x8x4xf32> to vector<8x4xf32>
    %cst_39 = arith.constant dense<0.000000e+00> : vector<4x4xf32>
    %56 = tpu.matmul %31, %55, %cst_39 {dimension_numbers = #tpu.dot_dimension_numbers<[1], [0], [0], [1], [0, 0, 1, 1], [], []>} : vector<4x8xf32>, vector<8x4xf32>, vector<4x4xf32> -> vector<4x4xf32>
    %c3_40 = arith.constant 3 : index
    %c0_41 = arith.constant 0 : index
    %c0_42 = arith.constant 0 : index
    %57 = vector.load %arg7[%c3_40, %c0_41, %c0_42] : memref<4x4x4xf32, #tpu.memory_space<vmem>>, vector<1x4x4xf32>
    %58 = vector.shape_cast %57 : vector<1x4x4xf32> to vector<4x4xf32>
    %59 = vector.shape_cast %56 : vector<4x4xf32> to vector<1x4x4xf32>
    tpu.vector_store %arg7[%c3_40, %c0_41, %c0_42], %59 {strides = array<i32>} : memref<4x4x4xf32, #tpu.memory_space<vmem>>, vector<1x4x4xf32>,
    return
  }
  func.func @transform_0(%arg0: i32) -> (i32, i32, i32) {
    %c0_i32 = arith.constant 0 : i32
    %c0_i32_0 = arith.constant 0 : i32
    %c0_i32_1 = arith.constant 0 : i32
    return %arg0, %c0_i32, %c0_i32_0 : i32, i32, i32
  }
  func.func @transform_1(%arg0: i32) -> (i32, i32) {
    %c0_i32 = arith.constant 0 : i32
    %c0_i32_0 = arith.constant 0 : i32
    %c0_i32_1 = arith.constant 0 : i32
    return %c0_i32, %c0_i32_0 : i32, i32
  }
  func.func @transform_2(%arg0: i32) -> (i32, i32) {
    %c0_i32 = arith.constant 0 : i32
    %c0_i32_0 = arith.constant 0 : i32
    %c0_i32_1 = arith.constant 0 : i32
    return %c0_i32, %c0_i32_0 : i32, i32
  }
  func.func @transform_3(%arg0: i32) -> (i32, i32) {
    %c0_i32 = arith.constant 0 : i32
    %c0_i32_0 = arith.constant 0 : i32
    %c0_i32_1 = arith.constant 0 : i32
    return %c0_i32, %c0_i32_0 : i32, i32
  }
  func.func @transform_4(%arg0: i32) -> (i32, i32) {
    %c0_i32 = arith.constant 0 : i32
    %c0_i32_0 = arith.constant 0 : i32
    %c0_i32_1 = arith.constant 0 : i32
    return %c0_i32, %c0_i32_0 : i32, i32
  }
  func.func @transform_5(%arg0: i32) -> (i32, i32, i32) {
    %c0_i32 = arith.constant 0 : i32
    %c0_i32_0 = arith.constant 0 : i32
    %c0_i32_1 = arith.constant 0 : i32
    return %arg0, %c0_i32, %c0_i32_0 : i32, i32, i32
  }
  func.func @transform_6(%arg0: i32) -> (i32, i32, i32) {
    %c0_i32 = arith.constant 0 : i32
    %c0_i32_0 = arith.constant 0 : i32
    %c0_i32_1 = arith.constant 0 : i32
    return %arg0, %c0_i32, %c0_i32_0 : i32, i32, i32
  }
}

</mosaic_0001>

<bundles_post_ra>
// kernel: tpu_custom_call.1
= control target key start
LH: loop header
LB: loop body
LE: loop exit
PB: predicated region body
PF: predicated region fallthrough
CT: control target
= control target key end

     0   :  { %12 = vsyncpa [#allocation3], 0  ;;  %s2292_s0 = inlined_call_operand.hbm [shape: f32[8,16,16], index: 0, kind: input, shape index: {}]   ;;  %s2293_s1 = inlined_call_operand.hbm [shape: f32[8,16], index: 1, kind: input, shape index: {}]   ;;  %s2294_s2 = inlined_call_operand.hbm [shape: f32[16,8], index: 2, kind: input, shape index: {}]   ;;  %s2295_s3 = inlined_call_operand.hbm [shape: f32[4,8], index: 3, kind: input, shape index: {}]   ;;  %s2296_s4 = inlined_call_operand.hbm [shape: f32[8,4], index: 4, kind: input, shape index: {}]   ;;  %s2297_s5 = inlined_call_operand.hbm [shape: f32[8,8,8], index: 5, kind: output, shape index: {0}]   ;;  %s2298_s6 = inlined_call_operand.hbm [shape: f32[8,4,4], index: 6, kind: output, shape index: {1}]  }
   0x1   :  { %14 = vsyncpa [#allocation3 + $0x1], 0 }
   0x2   :  { %15 = vsyncpa [#allocation6], 0 }
   0x3   :  { %16 = vsyncpa [#allocation9], 0 }
   0x4   :  { %17 = vsyncpa [#allocation4], 0 }
   0x5   :  { %19 = vsyncpa [#allocation4 + $0x1], 0 }
   0x6   :  { %20 = vsyncpa [#allocation13], 0 }
   0x7   :  { %22 = vsyncpa [#allocation13 + $0x1], 0  ;;  %s1923_s21 = smov 0   ;;  %s1925_s22 = smov 0  }
   0x8   :  { %s1927_s23 = smov 0   ;;  %s1929_s24 = smov 0  }
   0x9 LB: > { %s1944_s25 = sadd.s32 4294967295, %s1870_s24   ;;  %s1341_s26 = sadd.s32 4294967294, %s1870_s24   ;;  %s1870_s24 = sphi %s1929_s24, %s2321_s24   ;;  %s1866_s23 = sphi %s1927_s23, %s2320_s23   ;;  %s1862_s22 = sphi %s1925_s22, %s2319_s22   ;;  %s1858_s21 = sphi %s1923_s21, %s2318_s21  }
   0xa   : > { %p48_p0 = scmp.ne.s32.totalorder %s1862_s22, %s1858_s21  ;;  %p2299_p1 = scmp.eq.s32.totalorder %s1944_s25, 0 }
   0xb   : > { %p162_p3 = scmp.eq.s32.totalorder %s1341_s26, 1  ;;  %p1342_p5 = scmp.ge.s32.totalorder %s1870_s24, 1 }
   0xc   : > { %p1953_p4 = por %p2299_p1, %p48_p0  ;;  %p195_p7 = scmp.lt.s32.totalorder %s1870_s24, 3 }
   0xd   : > { %p1958_p6 = por %p162_p3, %p48_p0  ;;  %s1872_s30 = smov [#allocation5]  }
   0xe   : > { %s2302_s27 = scalar_select %p1953_p4, 1, 0 }
   0xf   : > { %s2303_s28 = scalar_select %p1958_p6, 1, 0 }
  0x10   : > { %p1963_p8 = pnand %p1342_p5, %p195_p7  ;;  %s208_s7 = sshll.u32 %s1872_s30, 4  ;;  %s209_s7 = int_to_ptr.vmem [resolvable:$true] %s208_s7 }
  0x11   : > { %s1873_s8 = smov [#allocation8]   ;;  %s1874_s11 = smov [#allocation7]  }
  0x12   : > { %s2304_s29 = scalar_select %p1963_p8, 1, 0 }
  0x13   : > { %p1543_p10 = pneg %p1963_p8  ;;  %s232_s9 = sshll.u32 %s1873_s8, 4  ;;  %s1976_s9 = int_to_ptr.vmem [resolvable:$true] %s232_s9 }
  0x14   : > { %s218_s12 = sshll.u32 %s1874_s11, 4  ;;  %s1622_s15 = scalar_lea.hbm %s2293_s1, 128  ;;  %s1978_s12 = int_to_ptr.vmem [resolvable:$true] %s218_s12 }
  0x15   : > { %p1972_p11 = pnand %p1543_p10, %p2299_p1  ;;  %p1623_p12 = scmp.ne.s32.totalorder %s2293_s1, %s1622_s15 }
  0x16   : > { %p1629_p5 = scmp.lt.u32.totalorder %s1622_s15, %s2293_s1 }
  0x17   : > { %p1988_p13 = pneg %p1972_p11 }
  0x19   : > { %p1625_p0 = pnand %p1988_p13, %p1623_p12 }
  0x1b   : > { %p1626_p3 = pneg %p1625_p0 }
  0x1d   : > { %p1631_p7 = pnand %p1629_p5, %p1626_p3 }
  0x1f   : > { %1634 = shalt.err (!%p1631_p7)
}
  0x20   : > { %s1635_s26 = scalar_lea.vmem %s209_s7, 128  ;;  %p1643_p2 = scmp.lt.s32.totalorder %s209_s7, %s209_s7 }
  0x21   : > { %p1636_p10 = scmp.ne.s32.totalorder %s209_s7, %s1635_s26  ;;  %p1644_p6 = scmp.lt.s32.totalorder %s1635_s26, %s1635_s26 }
  0x23   : > { %p1638_p9 = pnand %p1636_p10, %p1988_p13  ;;  %p1645_p4 = por %p1644_p6, %p1643_p2 }
  0x25   : > { %p1639_p1 = pneg %p1638_p9 }
  0x27   : > { %p1646_p8 = pnand %p1645_p4, %p1639_p1 }
  0x29   : > { %1649 = shalt.err (!%p1646_p8)
}
  0x2a   : > { %1546 = dma.hbm_to_vmem [thread:$0]  (!%p1972_p11), %s2293_s1, 128, %s209_s7, [#allocation6]  }
  0x2b   : > { %s1650_s14 = scalar_lea.hbm %s2295_s3, 64 }
  0x2c   : > { %p1651_p9 = scmp.ne.s32.totalorder %s2295_s3, %s1650_s14  ;;  %p1657_p1 = scmp.lt.u32.totalorder %s1650_s14, %s2295_s3 }
  0x2e   : > { %p1653_p12 = pnand %p1651_p9, %p1988_p13 }
  0x30   : > { %p1654_p2 = pneg %p1653_p12 }
  0x32   : > { %p1659_p4 = pnand %p1657_p1, %p1654_p2 }
  0x34   : > { %1662 = shalt.err (!%p1659_p4)
}
  0x35   : > { %s1663_s7 = scalar_lea.vmem %s1976_s9, 64  ;;  %p1671_p3 = scmp.lt.s32.totalorder %s1976_s9, %s1976_s9 }
  0x36   : > { %p1664_p6 = scmp.ne.s32.totalorder %s1976_s9, %s1663_s7  ;;  %p1672_p5 = scmp.lt.s32.totalorder %s1663_s7, %s1663_s7 }
  0x38   : > { %p1666_p8 = pnand %p1664_p6, %p1988_p13  ;;  %p1673_p7 = por %p1672_p5, %p1671_p3 }
  0x3a   : > { %p1667_p0 = pneg %p1666_p8 }
  0x3c   : > { %p1674_p10 = pnand %p1673_p7, %p1667_p0 }
  0x3e   : > { %1677 = shalt.err (!%p1674_p10)
}
  0x3f   : > { %1552 = dma.hbm_to_vmem [thread:$0]  (!%p1972_p11), %s2295_s3, 64, %s1976_s9, [#allocation9]  }
  0x40   : > { %s1678_s11 = scalar_lea.hbm %s2294_s2, 256 }
  0x41   : > { %p1679_p9 = scmp.ne.s32.totalorder %s2294_s2, %s1678_s11  ;;  %p1685_p1 = scmp.lt.u32.totalorder %s1678_s11, %s2294_s2 }
  0x43   : > { %p1681_p12 = pnand %p1679_p9, %p1988_p13 }
  0x45   : > { %p1682_p2 = pneg %p1681_p12 }
  0x47   : > { %p1687_p4 = pnand %p1685_p1, %p1682_p2 }
  0x49   : > { %1690 = shalt.err (!%p1687_p4)
}
  0x4a   : > { %s1691_s9 = scalar_lea.vmem %s1978_s12, 256  ;;  %p1699_p3 = scmp.lt.s32.totalorder %s1978_s12, %s1978_s12 }
  0x4b   : > { %p1692_p6 = scmp.ne.s32.totalorder %s1978_s12, %s1691_s9  ;;  %p1700_p5 = scmp.lt.s32.totalorder %s1691_s9, %s1691_s9 }
  0x4d   : > { %p1694_p8 = pnand %p1692_p6, %p1988_p13  ;;  %p1701_p7 = por %p1700_p5, %p1699_p3 }
  0x4f   : > { %p1695_p0 = pneg %p1694_p8 }
  0x51   : > { %p1702_p10 = pnand %p1701_p7, %p1695_p0 }
  0x53   : > { %1705 = shalt.err (!%p1702_p10)
}
  0x54   : > { %s1875_s17 = smov 128   ;;  %s1876_s19 = smov 8  }
  0x55   : > { %1549 = dma.hbm_to_vmem [thread:$0]  (!%p1972_p11), %s2294_s2, 256, %s1978_s12, [#allocation6], %s1875_s17, %s1875_s17, %s1876_s19  }
  0x56   : > { %s1877_s26 = smov [#allocation10]   ;;  %s1706_s13 = scalar_lea.hbm %s2296_s4, 128 }
  0x57   : > { %s243_s30 = sshll.u32 %s1877_s26, 4  ;;  %p1707_p9 = scmp.ne.s32.totalorder %s2296_s4, %s1706_s13  ;;  %s244_s30 = int_to_ptr.vmem [resolvable:$true] %s243_s30 }
  0x58   : > { %p1713_p1 = scmp.lt.u32.totalorder %s1706_s13, %s2296_s4 }
  0x59   : > { %p1709_p12 = pnand %p1707_p9, %p1988_p13 }
  0x5b   : > { %p1710_p2 = pneg %p1709_p12 }
  0x5d   : > { %p1715_p4 = pnand %p1713_p1, %p1710_p2 }
  0x5f   : > { %1718 = shalt.err (!%p1715_p4)
}
  0x60   : > { %s1719_s12 = scalar_lea.vmem %s244_s30, 128  ;;  %p1727_p3 = scmp.lt.s32.totalorder %s244_s30, %s244_s30 }
  0x61   : > { %p1720_p6 = scmp.ne.s32.totalorder %s244_s30, %s1719_s12  ;;  %p1728_p5 = scmp.lt.s32.totalorder %s1719_s12, %s1719_s12 }
  0x63   : > { %p1722_p8 = pnand %p1720_p6, %p1988_p13  ;;  %p1729_p7 = por %p1728_p5, %p1727_p3 }
  0x65   : > { %p1723_p0 = pneg %p1722_p8 }
  0x67   : > { %p1730_p10 = pnand %p1729_p7, %p1723_p0 }
  0x69   : > { %1733 = shalt.err (!%p1730_p10)
}
  0x6a   : > { %1555 = dma.hbm_to_vmem [thread:$0]  (!%p1972_p11), %s2296_s4, 128, %s244_s30, [#allocation9]  }
  0x6b   : > { %s2072_s18 = sadd.s32 1, %s1870_s24   ;;  %s35_s26 = sadd.s32 1, %s1866_s23 }
  0x6c   : > { %s32_s10 = ssub.s32 %s1870_s24, %s2072_s18  ;;  %p42_p13 = scmp.ne.s32.totalorder %s1866_s23, %s1862_s22 }
  0x6d   : > { %p33_p9 = scmp.eq.s32.totalorder %s32_s10, 0  ;;  %p43_p12 = scmp.eq.s32.totalorder %s1870_s24, 0 }
  0x6e   : > { %p2307_p2 = scmp.eq.s32.totalorder %s1944_s25, 1  ;;  %p1571_p4 = scmp.lt.s32.totalorder %s1870_s24, 2 }
  0x6f   : > { %s2088_s11 = scalar_select %p33_p9, %s1866_s23, %s35_s26  }
  0x70   : > { %p2082_p1 = por %p2307_p2, %p42_p13  ;;  %p44_p6 = por %p43_p12, %p42_p13 }
  0x71   : > { %s254_s13 = sand.u32 1, %s1866_s23   ;;  %s1395_s30 = sshll.u32 %s1870_s24, 10 }
  0x72   : > { %s1348_s14 = sshll.u32 %s254_s13, 6  ;;  %s2095_s9 = scalar_lea.hbm %s2292_s0, %s1395_s30 }
  0x73   : > { %s258_s12 = scalar_lea.vmem [#allocation2], %s1348_s14  ;;  %p2099_p11 = pnand %p1571_p4, %p44_p6 }
  0x74   : > { %s266_s7 = sshll.u32 %s258_s12, 4  ;;  %s2103_s26 = scalar_lea.sflag [#allocation3], %s254_s13  ;;  %s2097_s7 = int_to_ptr.vmem [resolvable:$true] %s266_s7 }
  0x75   : > { %s1734_s10 = scalar_lea.hbm %s2095_s9, 1024  ;;  %p1736_p0 = pneg %p2099_p11 }
  0x76   : > { %p1735_p8 = scmp.ne.s32.totalorder %s2095_s9, %s1734_s10  ;;  %s1739_s15 = scalar_lea.hbm %s2292_s0, 2048 }
  0x77   : > { %p1740_p7 = scmp.lt.u32.totalorder %s2095_s9, %s2292_s0  ;;  %p1741_p10 = scmp.lt.u32.totalorder %s1739_s15, %s1734_s10 }
  0x78   : > { %p1737_p3 = pnand %p1736_p0, %p1735_p8  ;;  %p1743_p9 = scmp.lt.u32.totalorder %s1734_s10, %s2095_s9 }
  0x79   : > { %p1742_p13 = por %p1741_p10, %p1740_p7 }
  0x7a   : > { %p1738_p5 = pneg %p1737_p3 }
  0x7b   : > { %p1744_p12 = por %p1743_p9, %p1742_p13 }
  0x7d   : > { %p1745_p2 = pnand %p1744_p12, %p1738_p5 }
  0x7f   : > { %1748 = shalt.err (!%p1745_p2)
}
  0x80   : > { %s1749_s13 = scalar_lea.vmem %s2097_s7, 1024  ;;  %s1878_s14 = smov [#allocation2]  }
  0x81   : > { %p1750_p4 = scmp.ne.s32.totalorder %s2097_s7, %s1749_s13  ;;  %s1754_s30 = sshll.u32 %s1878_s14, 4  ;;  %s1755_s30 = int_to_ptr.vmem [resolvable:$false] %s1754_s30 }
  0x82   : > { %s1756_s16 = scalar_lea.vmem %s1755_s30, 2048  ;;  %p1757_p3 = scmp.lt.s32.totalorder %s2097_s7, %s1755_s30 }
  0x83   : > { %p1752_p6 = pnand %p1750_p4, %p1736_p0  ;;  %p1758_p7 = scmp.lt.s32.totalorder %s1756_s16, %s1749_s13 }
  0x85   : > { %p1753_p8 = pneg %p1752_p6  ;;  %p1759_p10 = por %p1758_p7, %p1757_p3 }
  0x87   : > { %p1760_p13 = pnand %p1759_p10, %p1753_p8 }
  0x89   : > { %1763 = shalt.err (!%p1760_p13)
}
  0x8a   : > { %1559 = dma.hbm_to_vmem [thread:$0]  (!%p2099_p11), %s2095_s9, 1024, %s2097_s7, %s2103_s26, %s1875_s17, %s1875_s17, %s1876_s19  }
  0x8b   : > { %p2310_p0 = scmp.ne.s32.totalorder %s2304_s29, 0 }
  0x8c   : > { %s2137_s10 = sand.u32 (!%p2310_p0), 1, %s1862_s22   ;;  %p2311_p5 = scmp.ne.s32.totalorder (!%p2310_p0), %s2302_s27, 0 }
  0x8d   : > { %278 = sbr.rel (%p2310_p0) target bundleno = 1053 (0x41d), region = 40  ;;  %s1353_s15 = sshll.u32 (!%p2310_p0), %s2137_s10, 6 }
  0x8e   : > { %s281_s12 = scalar_lea.sflag (!%p2310_p0), [#allocation3], %s2137_s10  ;;  %s284_s13 = scalar_lea.vmem (!%p2310_p0), [#allocation2], %s1353_s15 }
  0x94   : > { %1837 = dma.done.wait (%p2311_p5), %s281_s12, 1024  }
  0x95   : > { %1839 = vsyncadd (%p2311_p5), %s281_s12, 4294966272  ;;  %p2312_p9 = scmp.eq.s32.totalorder %s1944_s25, 0 }
  0x97   : > { %1841 = dma.done.wait (%p2312_p9), [#allocation6], 384   ;;  %p2313_p11 = pmov %p2312_p9 }
  0x98   : > { %p2314_p12 = pmov %p2312_p9 }
  0x99   : > { %1843 = vsyncadd (%p2313_p11), [#allocation6], 4294966912 }
  0x9a   : > { %1845 = dma.done.wait (%p2314_p12), [#allocation9], 192   ;;  %p2315_p2 = pmov %p2312_p9 }
  0x9b   : > { %vm348_vm0 = vcmask 130048   ;;  %v346_v0 = vld [vmem:[#allocation7] sm:$0xff]  ;;  %v347_v1 = vld [vmem:[#allocation7 + $0x8] sm:$0xff]  ;;  %v337_v2 = vld [vmem:[%s284_s13] sm:$0xff]  ;;  %v1879_v11 = vmov 0.0|0.0   ;;  %vm1880_vm1 = vmmov 0  }
  0x9c   : > { %1847 = vsyncadd (%p2315_p2), [#allocation9], 4294967104  ;;  %v1505_v3 = vpack.c.bf16 %v347_v1, %v346_v0  ;;  %1437 = vmatprep.mubr.msk.f32.mxu0 %vm348_vm0, %v337_v2  ;;  %v338_v4 = vld [vmem:[%s284_s13 + $0x8] sm:$0xff]  ;;  %v339_v5 = vld [vmem:[%s284_s13 + $0x10] sm:$0xff]  ;;  %1509 = vmatprep.subr.bf16.mxu1 %v1879_v11  ;;  %v1881_v12 = vmov 0.0   ;;  %s1358_s27 = sshll.u32 %s2137_s10, 5 }
  0x9d   : > { %v340_v6 = vld [vmem:[%s284_s13 + $0x18] sm:$0xff]  ;;  %v341_v7 = vld [vmem:[%s284_s13 + $0x20] sm:$0xff]  ;;  %v342_v8 = vld [vmem:[%s284_s13 + $0x28] sm:$0xff]  ;;  %1453 = vmatprep.mubr.msk.f32.mxu1 %vm1880_vm1, %v1881_v12  ;;  %vm551_vm2 = vcmask 64512   ;;  %s2178_s29 = scalar_lea.vmem [#allocation11], %s1358_s27  ;;  %s1396_s17 = sshll.u32 %s1944_s25, 9 }
  0x9e   : > { %1506 = vmatprep.subr.bf16.mxu0 %v1505_v3  ;;  %v343_v9 = vld [vmem:[%s284_s13 + $0x30] sm:$0xff]  ;;  %v344_v10 = vld [vmem:[%s284_s13 + $0x38] sm:$0xff]  ;;  %v345_v17 = vld [vmem:[#allocation5] sm:$0xff]  ;;  %s1182_s19 = sshll.u32 %s2178_s29, 4  ;;  %s2213_s20 = scalar_lea.hbm %s2297_s5, %s1396_s17  ;;  %s2215_s19 = int_to_ptr.vmem [resolvable:$true] %s1182_s19 }
  0x9f   : > { %1508 = vmatpush3.bf16.msra.mxu0 %v1505_v3  ;;  %v774_v26 = vld [vmem:[#allocation10] sm:$0xff]  ;;  %v773_v40 = vld [vmem:[#allocation8] sm:$0xf]  ;;  %s1164_s26 = scalar_lea.sflag [#allocation4], %s2137_s10  ;;  %s1764_s14 = scalar_lea.vmem %s2215_s19, 512 }
  0xa0   : > { %1477 = vmatprep.subr.mxu0 %v774_v26  ;;  %p1765_p4 = scmp.ne.s32.totalorder %s2215_s19, %s1764_s14  ;;  %s1882_s30 = smov [#allocation11]  }
  0xa1   : > { %s1768_s16 = sshll.u32 %s1882_s30, 4  ;;  %s1769_s16 = int_to_ptr.vmem [resolvable:$false] %s1768_s16 }
  0xa2   : > { %1438 = vmatmul.mubr.msk.f32.vlgmr.msra.gmra.mrb[0].mxu0 %vm348_vm0, %v338_v4  ;;  %p1766_p6 = pnand %p1765_p4, %p2082_p1  ;;  %s1770_s15 = scalar_lea.vmem %s1769_s16, 1024 }
  0xa3   : > { %1440 = vmatprep.mubr.msk.f32.mxu0 %vm348_vm0, %v339_v5  ;;  %1478 = vmatpush3.msra.mxu0 %v774_v26  ;;  %p1771_p3 = scmp.lt.s32.totalorder %s2215_s19, %s1769_s16  ;;  %p1772_p7 = scmp.lt.s32.totalorder %s1770_s15, %s1764_s14 }
  0xa4   : > { %1495 = vmatprep.subr.mxu0 %v1881_v12  ;;  %p1767_p8 = pneg %p1766_p6 }
  0xa5   : > { %p1773_p10 = por %p1772_p7, %p1771_p3 }
  0xa6   : > { %1441 = vmatmul.mubr.msk.f32.gmra.mrb[2].mxu0 %vm348_vm0, %v340_v6 }
  0xa7   : > { %1443 = vmatprep.mubr.msk.f32.mxu0 %vm348_vm0, %v341_v7  ;;  %p1774_p13 = pnand %p1773_p10, %p1767_p8 }
  0xaa   : > { %1444 = vmatmul.mubr.msk.f32.gmra.mrb[4].mxu0 %vm348_vm0, %v342_v8 }
  0xab   : > { %1446 = vmatprep.mubr.msk.f32.mxu0 %vm348_vm0, %v343_v9 }
  0xae   : > { %1447 = vmatmul.mubr.msk.f32.gmra.mrb[6].mxu0 %vm348_vm0, %v344_v10 }
 0x175   : > { %v1439_v13 = vpop.f32.mrb[0].mxu0 }
 0x176   : > { %v439_v14 = vpop.f32.mrb[1].mxu0 }
 0x177   : > { %v1510_v15 = vpack.c.bf16 %v1439_v13, %v439_v14 }
 0x179   : > { %v1442_v16 = vpop.f32.mrb[2].mxu0  ;;  %1511 = vmatpush3.bf16.msra.mxu1 %v1510_v15 }
 0x17a   : > { %v449_v18 = vpop.f32.mrb[3].mxu0  ;;  %1512 = vmatprep.subr.bf16.mxu1 %v1879_v11 }
 0x17b   : > { %v1513_v19 = vpack.c.bf16 %v1442_v16, %v449_v18 }
 0x17c   : > { %1454 = vmatmul.mubr.msk.f32.vlgmr.msra.gmra.mrb[0].mxu1 %vm348_vm0, %v345_v17 }
 0x17d   : > { %v1445_v20 = vpop.f32.mrb[4].mxu0  ;;  %1514 = vmatpush3.bf16.msra.mxu1 %v1513_v19  ;;  %1460 = vmatprep.mubr.msk.f32.mxu1 %vm1880_vm1, %v1881_v12 }
 0x17e   : > { %v459_v21 = vpop.f32.mrb[5].mxu0  ;;  %1515 = vmatprep.subr.bf16.mxu1 %v1879_v11 }
 0x17f   : > { %v1516_v22 = vpack.c.bf16 %v1445_v20, %v459_v21 }
 0x180   : > { %1461 = vmatmul.mubr.msk.f32.vlgmr.msra.gmra.mrb[2].mxu1 %vm348_vm0, %v345_v17 }
 0x181   : > { %v1448_v23 = vpop.f32.mrb[6].mxu0  ;;  %1517 = vmatpush3.bf16.msra.mxu1 %v1516_v22  ;;  %1467 = vmatprep.mubr.msk.f32.mxu1 %vm1880_vm1, %v1881_v12 }
 0x182   : > { %v469_v24 = vpop.f32.mrb[7].mxu0  ;;  %1518 = vmatprep.subr.bf16.mxu1 %v1879_v11 }
 0x183   : > { %v1519_v25 = vpack.c.bf16 %v1448_v23, %v469_v24 }
 0x184   : > { %1468 = vmatmul.mubr.msk.f32.vlgmr.msra.gmra.mrb[4].mxu1 %vm348_vm0, %v345_v17 }
 0x185   : > { %1520 = vmatpush3.bf16.msra.mxu1 %v1519_v25  ;;  %1474 = vmatprep.mubr.msk.f32.mxu1 %vm1880_vm1, %v1881_v12 }
 0x186   : > { %1485 = vmatprep.subr.mxu1 %v1881_v12 }
 0x188   : > { %1475 = vmatmul.mubr.msk.f32.vlgmr.msra.gmra.mrb[6].mxu1 %vm348_vm0, %v345_v17 }
 0x189   : > { %1487 = vmatprep.mubr.msk.f32.mxu1 %vm1880_vm1, %v1881_v12 }
 0x24f   : > { %v547_v27 = vpop.f32.mrb[0].mxu1 }
 0x250   : > { %552 = vst.msk [vmem:[%s2178_s29] sm:$0xff] %vm551_vm2, %v547_v27  ;;  %v1455_v28 = vpop.f32.mrb[1].mxu1 }
 0x253   : > { %v619_v29 = vpop.f32.mrb[2].mxu1 }
 0x254   : > { %1370 = vst.msk [vmem:[%s2178_s29 + $0x8] sm:$0xff] %vm551_vm2, %v619_v29  ;;  %v1462_v30 = vpop.f32.mrb[3].mxu1 }
 0x257   : > { %v691_v31 = vpop.f32.mrb[4].mxu1  ;;  %v769_v32 = vld [vmem:[%s2178_s29] sm:$0xff] }
 0x258   : > { %1372 = vst.msk [vmem:[%s2178_s29 + $0x10] sm:$0xff] %vm551_vm2, %v691_v31  ;;  %v1469_v33 = vpop.f32.mrb[5].mxu1  ;;  %1479 = vmatprep.mubr.msk.f32.mxu0 %vm551_vm2, %v769_v32 }
 0x25b   : > { %v763_v34 = vpop.f32.mrb[6].mxu1  ;;  %v770_v35 = vld [vmem:[%s2178_s29 + $0x8] sm:$0xff] }
 0x25c   : > { %1374 = vst.msk [vmem:[%s2178_s29 + $0x18] sm:$0xff] %vm551_vm2, %v763_v34  ;;  %v1476_v36 = vpop.f32.mrb[7].mxu1  ;;  %1480 = vmatmul.mubr.msk.f32.vlgmr.msra.gmra.mrb[8].mxu0 %vm551_vm2, %v770_v35 }
 0x25f   : > { %v771_v37 = vld [vmem:[%s2178_s29 + $0x10] sm:$0xff] }
 0x260   : > { %1482 = vmatprep.mubr.msk.f32.mxu0 %vm551_vm2, %v771_v37 }
 0x263   : > { %v772_v38 = vld [vmem:[%s2178_s29 + $0x18] sm:$0xff] }
 0x264   : > { %1483 = vmatmul.mubr.msk.f32.gmra.mrb[10].mxu0 %vm551_vm2, %v772_v38 }
 0x265   : > { %1497 = vmatprep.mubr.msk.f32.mxu0 %vm1880_vm1, %v1881_v12 }
 0x32f   : > { %v1481_v39 = vpop.f32.mrb[8].mxu0 }
 0x330   : > { %v853_v41 = vpop.f32.mrb[9].mxu0 }
 0x331   : > { %1486 = vmatpush3.msra.mxu1 %v853_v41 }
 0x332   : > { %1490 = vmatprep.subr.mxu1 %v1881_v12  ;;  %1488 = vmatmul.mubr.msk.f32.vlgmr.msra.gmra.mrb[8].mxu1 %vm551_vm2, %v773_v40 }
 0x333   : > { %1491 = vmatpush3.msra.mxu1 %v1481_v39  ;;  %1492 = vmatprep.mubr.msk.f32.mxu1 %vm1880_vm1, %v1881_v12 }
 0x334   : > { %1500 = vmatprep.subr.mxu1 %v1881_v12 }
 0x336   : > { %1493 = vmatmul.mubr.msk.f32.vlgmr.msra.gmra.mrb[10].mxu1 %vm551_vm2, %v773_v40 }
 0x337   : > { %v1484_v42 = vpop.f32.mrb[10].mxu0  ;;  %1502 = vmatprep.mubr.msk.f32.mxu1 %vm1880_vm1, %v1881_v12 }
 0x338   : > { %v863_v43 = vpop.f32.mrb[11].mxu0  ;;  %1501 = vmatpush3.msra.mxu1 %v1484_v42 }
 0x339   : > { %1496 = vmatpush3.msra.mxu0 %v863_v43 }
 0x33a   : > { %1498 = vmatmul.mubr.msk.f32.vlgmr.msra.gmra.mrb[12].mxu0 %vm551_vm2, %v773_v40  ;;  %1503 = vmatmul.mubr.msk.f32.vlgmr.msra.gmra.mrb[12].mxu1 %vm551_vm2, %v773_v40 }
 0x33b   : > { %1777 = shalt.err (!%p1774_p13)
}
 0x33c   : > { %s1778_s12 = scalar_lea.hbm %s2213_s20, 512  ;;  %s1782_s29 = scalar_lea.hbm %s2297_s5, 1024 }
 0x33d   : > { %p1779_p0 = scmp.ne.s32.totalorder %s2213_s20, %s1778_s12  ;;  %p1783_p11 = scmp.lt.u32.totalorder %s2213_s20, %s2297_s5 }
 0x33e   : > { %p1784_p12 = scmp.lt.u32.totalorder %s1782_s29, %s1778_s12  ;;  %p1786_p4 = scmp.lt.u32.totalorder %s1778_s12, %s2213_s20 }
 0x33f   : > { %p1780_p5 = pnand %p1779_p0, %p2082_p1 }
 0x340   : > { %p1785_p2 = por %p1784_p12, %p1783_p11 }
 0x341   : > { %p1781_p9 = pneg %p1780_p5 }
 0x342   : > { %p1787_p6 = por %p1786_p4, %p1785_p2 }
 0x344   : > { %p1788_p8 = pnand %p1787_p6, %p1781_p9 }
 0x346   : > { %1791 = shalt.err (!%p1788_p8)
}
 0x347   : > { %s1883_s7 = smov 128   ;;  %s1884_s14 = smov 8   ;;  %vm945_vm3 = vcmask 27648  }
 0x348   : > { %1539 = dma.vmem_to_hbm [thread:$0]  (%p2082_p1), %s2215_s19, 512, %s2213_s20, %s1164_s26, %s1883_s7, %s1883_s7, %s1884_s14  }
 0x349   : > { %s1359_s30 = sshll.u32 %s2137_s10, 4  ;;  %s1397_s12 = sshll.u32 %s1944_s25, 8 }
 0x34a   : > { %s333_s16 = scalar_lea.vmem [#allocation12], %s1359_s30  ;;  %s2248_s19 = scalar_lea.hbm %s2298_s6, %s1397_s12 }
 0x34b   : > { %s1198_s15 = sshll.u32 %s333_s16, 4  ;;  %s1169_s20 = scalar_lea.sflag [#allocation13], %s2137_s10  ;;  %s2243_s15 = int_to_ptr.vmem [resolvable:$true] %s1198_s15 }
 0x34c   : > { %s1792_s25 = scalar_lea.vmem %s2243_s15, 256  ;;  %s1885_s26 = smov [#allocation12]  }
 0x34d   : > { %p1793_p3 = scmp.ne.s32.totalorder %s2243_s15, %s1792_s25  ;;  %s1796_s29 = sshll.u32 %s1885_s26, 4  ;;  %s1797_s29 = int_to_ptr.vmem [resolvable:$false] %s1796_s29 }
 0x34e   : > { %s1798_s17 = scalar_lea.vmem %s1797_s29, 512  ;;  %p1799_p13 = scmp.lt.s32.totalorder %s2243_s15, %s1797_s29 }
 0x34f   : > { %p1794_p7 = pnand %p1793_p3, %p2082_p1  ;;  %p1800_p0 = scmp.lt.s32.totalorder %s1798_s17, %s1792_s25 }
 0x351   : > { %p1795_p10 = pneg %p1794_p7  ;;  %p1801_p5 = por %p1800_p0, %p1799_p13 }
 0x353   : > { %p1802_p9 = pnand %p1801_p5, %p1795_p10 }
 0x405   : > { %v941_v44 = vpop.f32.mrb[8].mxu1 }
 0x406   : > { %946 = vst.msk [vmem:[%s333_s16] sm:$0xf] %vm945_vm3, %v941_v44  ;;  %v1489_v45 = vpop.f32.mrb[9].mxu1 }
 0x409   : > { %v1013_v46 = vpop.f32.mrb[10].mxu1 }
 0x40a   : > { %1381 = vst.msk [vmem:[%s333_s16 + $0x4] sm:$0xf] %vm945_vm3, %v1013_v46  ;;  %v1494_v47 = vpop.f32.mrb[11].mxu1 }
 0x40d   : > { %v1085_v48 = vpop.f32.mrb[12].mxu0  ;;  %v1157_v49 = vpop.f32.mrb[12].mxu1 }
 0x40e   : > { %1383 = vst.msk [vmem:[%s333_s16 + $0x8] sm:$0xf] %vm945_vm3, %v1085_v48  ;;  %1385 = vst.msk [vmem:[%s333_s16 + $0xc] sm:$0xf] %vm945_vm3, %v1157_v49  ;;  %v1499_v50 = vpop.f32.mrb[13].mxu0  ;;  %v1504_v51 = vpop.f32.mrb[13].mxu1 }
 0x40f   : > { %1805 = shalt.err (!%p1802_p9)
}
 0x410   : > { %s1806_s9 = scalar_lea.hbm %s2248_s19, 256  ;;  %s1810_s30 = scalar_lea.hbm %s2298_s6, 512 }
 0x411   : > { %p1807_p11 = scmp.ne.s32.totalorder %s2248_s19, %s1806_s9  ;;  %p1811_p4 = scmp.lt.u32.totalorder %s2248_s19, %s2298_s6 }
 0x412   : > { %p1812_p6 = scmp.lt.u32.totalorder %s1810_s30, %s1806_s9  ;;  %p1814_p3 = scmp.lt.u32.totalorder %s1806_s9, %s2248_s19 }
 0x413   : > { %p1808_p12 = pnand %p1807_p11, %p2082_p1 }
 0x414   : > { %p1813_p8 = por %p1812_p6, %p1811_p4 }
 0x415   : > { %p1809_p2 = pneg %p1808_p12 }
 0x416   : > { %p1815_p7 = por %p1814_p3, %p1813_p8 }
 0x418   : > { %p1816_p10 = pnand %p1815_p7, %p1809_p2 }
 0x41a   : > { %1819 = shalt.err (!%p1816_p10)
}
 0x41b   : > { %s1886_s13 = smov 64   ;;  %s1887_s27 = smov 4  }
 0x41c   : > { %1540 = dma.vmem_to_hbm [thread:$0]  (%p2082_p1), %s2243_s15, 256, %s2248_s19, %s1169_s20, %s1886_s13, %s1886_s13, %s1887_s27  }
 0x41d PF: > { %s1213_s25 = sand.u32 1, %s1858_s21   ;;  %p2316_p13 = scmp.ne.s32.totalorder %s2303_s28, 0 }
 0x41e   : > { %p2317_p0 = scmp.ge.s32.totalorder %s1870_s24, 2  ;;  %s1214_s26 = scalar_lea.sflag [#allocation4], %s1213_s25 }
 0x420   : > { %p1561_p5 = pnand %p2317_p0, %p2316_p13 }
 0x422   : > { %1849 = dma.done.wait (!%p1561_p5), %s1214_s26, 512  }
 0x423   : > { %1851 = vsyncadd (!%p1561_p5), %s1214_s26, 4294966784  ;;  %s1223_s29 = scalar_lea.sflag [#allocation13], %s1213_s25 }
 0x424   : > { %1853 = dma.done.wait (!%p1561_p5), %s1223_s29, 256  }
 0x425   : > { %1855 = vsyncadd (!%p1561_p5), %s1223_s29, 4294967040  ;;  %p25_p1 = scmp.ge.s32.totalorder %s2072_s18, 4   ;;  %s2318_s21 = smov %s1862_s22 }
 0x426   : > { %s2319_s22 = smov %s1866_s23  ;;  %s2320_s23 = smov %s2088_s11 }
 0x427   : > { %s2321_s24 = smov %s2072_s18  ;;  %27 = sbr.rel (!%p25_p1) target bundleno = 9 (0x9), region = 124 }
 0x42e   :  { %1228 = vsyncpa [#allocation3], 1 }
 0x42f   :  { %1230 = vsyncpa [#allocation3 + $0x1], 1 }
 0x430   :  { %1231 = vsyncpa [#allocation6], 1 }
 0x431   :  { %1232 = vsyncpa [#allocation9], 1 }
 0x432   :  { %1233 = vsyncpa [#allocation4], 1 }
 0x433   :  { %1235 = vsyncpa [#allocation4 + $0x1], 1 }
 0x434   :  { %1236 = vsyncpa [#allocation13], 1 }
 0x435   :  { %1238 = vsyncpa [#allocation13 + $0x1], 1 }

</bundles_post_ra>
